<compile_context>
chip_gen: v5e
topology: v5e:2x2
jax: 0.10.0
libtpu: 0.0.40
codegen_flags: <defaults>
</compile_context>

<pallas_src>
import functools

import jax
import jax.numpy as jnp
from jax.experimental import pallas as pl
from jax.experimental.pallas import tpu as pltpu


def _rdb_conv_kernel(x_ref, w_ref, b_ref, o_ref, *, width):
    """One batch element per grid step.

    x_ref : (1, Cin, H*W)    flattened (lane-dense) input image
    w_ref : (Cout, 9*Cin)    conv weights, K ordered as (kh, kw, cin)
    b_ref : (Cout, 1)        conv bias
    o_ref : (1, Cout, H*W)   relu(conv(x)), lane-dense
    """
    cin = x_ref.shape[1]
    hw = x_ref.shape[2]
    w = width
    h = hw // w

    x = x_ref[0].astype(jnp.float32)                      # (Cin, H*W)

    # Zero-extend the flat pixel axis by (W+1) on each side.  Together with the
    # column masks below this reproduces a 1-pixel zero border without ever
    # materializing a padded image in HBM or reshaping it in VMEM.
    zext = jnp.zeros((cin, w + 1), jnp.float32)
    x_ext = jnp.concatenate([zext, x, zext], axis=1)      # (Cin, H*W + 2W + 2)

    # Column masks with period W, built without integer div/rem: a (1, W) row
    # pattern concatenated H times along the lane axis.
    col_iota = jax.lax.broadcasted_iota(jnp.int32, (1, w), 1)
    row_not_first = (col_iota != 0).astype(jnp.float32)          # (1, W)
    row_not_last = (col_iota != (w - 1)).astype(jnp.float32)     # (1, W)
    not_first_col = jnp.concatenate([row_not_first] * h, axis=1)  # (1, H*W)
    not_last_col = jnp.concatenate([row_not_last] * h, axis=1)    # (1, H*W)

    # im2col: tap (kh, kw) of the padded conv is a lane-shifted window of the
    # zero-extended flat image.  kw = 0 / kw = 2 taps must not wrap across row
    # boundaries; the column masks zero exactly those contributions.
    pieces = []
    for kh in range(3):
        for kw in range(3):
            start = kh * w + kw                            # static lane offset
            piece = x_ext[:, start:start + hw]             # (Cin, H*W)
            if kw == 0:
                piece = piece * not_first_col
            elif kw == 2:
                piece = piece * not_last_col
            pieces.append(piece)
    patches = jnp.concatenate(pieces, axis=0)              # (9*Cin, H*W)

    # Single fused MXU matmul: (Cout, 9*Cin) @ (9*Cin, H*W) -> (Cout, H*W).
    acc = jnp.dot(w_ref[...].astype(jnp.float32), patches,
                  preferred_element_type=jnp.float32)
    acc = acc + b_ref[...].astype(jnp.float32)             # (Cout, 1) broadcast
    o_ref[0] = jnp.maximum(acc, 0.0).astype(o_ref.dtype)   # lane-dense store


@jax.jit
def rdb_conv_forward(x, weight, bias):
    """RDB_Conv forward: concat([x, relu(conv3x3(x))], channel axis).

    x      : (N, Cin, H, W)     NCHW (PyTorch layout)
    weight : (Cout, Cin, 3, 3)  OIHW (nn.Conv2d layout)
    bias   : (Cout,)
    returns (N, Cin + Cout, H, W)
    """
    n, cin, height, width = x.shape
    cout = weight.shape[0]
    hw = height * width

    # Free contiguous reshape: put all pixels on the lane axis.
    x_flat = x.reshape(n, cin, hw)
    # (Cout, Cin, 3, 3) -> (Cout, 3, 3, Cin) -> (Cout, 9*Cin); K = (kh, kw, cin).
    w_mat = jnp.transpose(weight, (0, 2, 3, 1)).reshape(cout, 9 * cin)
    b_mat = bias.reshape(cout, 1)

    conv_flat = pl.pallas_call(
        functools.partial(_rdb_conv_kernel, width=width),
        out_shape=jax.ShapeDtypeStruct((n, cout, hw), x.dtype),
        grid_spec=pltpu.PrefetchScalarGridSpec(
            num_scalar_prefetch=0,
            grid=(n,),
            in_specs=[
                pl.BlockSpec((1, cin, hw), lambda i: (i, 0, 0)),
                pl.BlockSpec((cout, 9 * cin), lambda i: (0, 0)),
                pl.BlockSpec((cout, 1), lambda i: (0, 0)),
            ],
            out_specs=pl.BlockSpec((1, cout, hw), lambda i: (i, 0, 0)),
        ),
        compiler_params=pltpu.CompilerParams(
            dimension_semantics=("parallel",),   # shard batch across TCs (v7x)
            vmem_limit_bytes=32 * 1024 * 1024,
        ),
    )(x_flat, w_mat, b_mat)

    # TODO(synk): for production-sized images (H, W >= 128, larger Cin) add an
    # H-tile grid axis with a 1-row halo so double-buffered blocks fit v7x VMEM.
    conv_out = conv_flat.reshape(n, cout, height, width)   # free reshape
    return jnp.concatenate([x, conv_out], axis=1)          # torch.cat((x, out), 1)


if __name__ == "__main__":
    # Small deterministic config consistent with RDB_Conv(in_dim, out_dim).
    N, Cin, H, W = 2, 4, 16, 16
    Cout = 8

    key = jax.random.PRNGKey(0)
    kx, kw_key, kb = jax.random.split(key, 3)
    x = jax.random.normal(kx, (N, Cin, H, W), jnp.float32)
    weight = 0.1 * jax.random.normal(kw_key, (Cout, Cin, 3, 3), jnp.float32)
    bias = 0.1 * jax.random.normal(kb, (Cout,), jnp.float32)

    out = jax.block_until_ready(rdb_conv_forward(x, weight, bias))
    assert out.shape == (N, Cin + Cout, H, W), out.shape

    # Reference check: same semantics as nn.Conv2d(Cin, Cout, 3, 1, 1) + ReLU
    # followed by torch.cat((x, out), 1).
    conv_ref = jax.lax.conv_general_dilated(
        x, weight, window_strides=(1, 1), padding=((1, 1), (1, 1)),
        dimension_numbers=("NCHW", "OIHW", "NCHW"))
    ref = jnp.concatenate(
        [x, jnp.maximum(conv_ref + bias[None, :, None, None], 0.0)], axis=1)
    assert jnp.allclose(out, ref, atol=1e-4, rtol=1e-4), (
        float(jnp.max(jnp.abs(out - ref))))

    print("KERNEL_OK")
</pallas_src>

<mosaic_0001>
module attributes {stable_mosaic.version = 11 : i64} {
  func.func @_rdb_conv_kernel(%arg0: i32, %arg1: memref<1x4x256xf32, #tpu.memory_space<vmem>>, %arg2: memref<8x36xf32, #tpu.memory_space<vmem>>, %arg3: memref<8x1xf32, #tpu.memory_space<vmem>>, %arg4: memref<1x8x256xf32, #tpu.memory_space<vmem>>) attributes {dimension_semantics = [#tpu.dimension_semantics<parallel>], iteration_bounds = array<i64: 2>, scalar_prefetch = 0 : i64, scratch_operands = 0 : i64, tpu.core_type = #tpu.core_type<tc>, window_params = [{transform_indices = @transform_0, window_bounds = array<i64: 1, 4, 256>}, {pipeline_mode = #tpu.pipeline_mode<synchronous>, transform_indices = @transform_1, window_bounds = array<i64: 8, 36>}, {pipeline_mode = #tpu.pipeline_mode<synchronous>, transform_indices = @transform_2, window_bounds = array<i64: 8, 1>}, {transform_indices = @transform_3, window_bounds = array<i64: 1, 8, 256>}]} {
    %c0 = arith.constant 0 : index
    %c0_0 = arith.constant 0 : index
    %c0_1 = arith.constant 0 : index
    %0 = vector.load %arg1[%c0, %c0_0, %c0_1] : memref<1x4x256xf32, #tpu.memory_space<vmem>>, vector<1x4x256xf32>
    %1 = vector.shape_cast %0 : vector<1x4x256xf32> to vector<4x256xf32>
    %cst = arith.constant 0.000000e+00 : f32
    %2 = vector.broadcast %cst : f32 to vector<4x17xf32>
    %3 = tpu.concatenate %2, %1, %2 in 1 : vector<4x17xf32>, vector<4x256xf32>, vector<4x17xf32> -> vector<4x290xf32>
    %4 = tpu.iota {dimensions = array<i32: 1>} : vector<1x16xi32>
    %c0_i32 = arith.constant 0 : i32
    %5 = vector.broadcast %c0_i32 : i32 to vector<1x16xi32>
    %6 = arith.cmpi ne, %4, %5 : vector<1x16xi32>
    %7 = arith.extui %6 : vector<1x16xi1> to vector<1x16xi32>
    %8 = arith.sitofp %7 : vector<1x16xi32> to vector<1x16xf32>
    %c15_i32 = arith.constant 15 : i32
    %9 = vector.broadcast %c15_i32 : i32 to vector<1x16xi32>
    %10 = arith.cmpi ne, %4, %9 : vector<1x16xi32>
    %11 = arith.extui %10 : vector<1x16xi1> to vector<1x16xi32>
    %12 = arith.sitofp %11 : vector<1x16xi32> to vector<1x16xf32>
    %13 = tpu.concatenate %8, %8, %8, %8, %8, %8, %8, %8, %8, %8, %8, %8, %8, %8, %8, %8 in 1 : vector<1x16xf32>, vector<1x16xf32>, vector<1x16xf32>, vector<1x16xf32>, vector<1x16xf32>, vector<1x16xf32>, vector<1x16xf32>, vector<1x16xf32>, vector<1x16xf32>, vector<1x16xf32>, vector<1x16xf32>, vector<1x16xf32>, vector<1x16xf32>, vector<1x16xf32>, vector<1x16xf32>, vector<1x16xf32> -> vector<1x256xf32>
    %14 = tpu.concatenate %12, %12, %12, %12, %12, %12, %12, %12, %12, %12, %12, %12, %12, %12, %12, %12 in 1 : vector<1x16xf32>, vector<1x16xf32>, vector<1x16xf32>, vector<1x16xf32>, vector<1x16xf32>, vector<1x16xf32>, vector<1x16xf32>, vector<1x16xf32>, vector<1x16xf32>, vector<1x16xf32>, vector<1x16xf32>, vector<1x16xf32>, vector<1x16xf32>, vector<1x16xf32>, vector<1x16xf32>, vector<1x16xf32> -> vector<1x256xf32>
    %15 = vector.extract_strided_slice %3 {offsets = [0, 0], sizes = [4, 256], strides = [1, 1]} : vector<4x290xf32> to vector<4x256xf32>
    %16 = vector.broadcast %13 : vector<1x256xf32> to vector<4x256xf32>
    %17 = arith.mulf %15, %16 : vector<4x256xf32>
    %18 = vector.extract_strided_slice %3 {offsets = [0, 1], sizes = [4, 256], strides = [1, 1]} : vector<4x290xf32> to vector<4x256xf32>
    %19 = vector.extract_strided_slice %3 {offsets = [0, 2], sizes = [4, 256], strides = [1, 1]} : vector<4x290xf32> to vector<4x256xf32>
    %20 = vector.broadcast %14 : vector<1x256xf32> to vector<4x256xf32>
    %21 = arith.mulf %19, %20 : vector<4x256xf32>
    %22 = vector.extract_strided_slice %3 {offsets = [0, 16], sizes = [4, 256], strides = [1, 1]} : vector<4x290xf32> to vector<4x256xf32>
    %23 = vector.broadcast %13 : vector<1x256xf32> to vector<4x256xf32>
    %24 = arith.mulf %22, %23 : vector<4x256xf32>
    %25 = vector.extract_strided_slice %3 {offsets = [0, 17], sizes = [4, 256], strides = [1, 1]} : vector<4x290xf32> to vector<4x256xf32>
    %26 = vector.extract_strided_slice %3 {offsets = [0, 18], sizes = [4, 256], strides = [1, 1]} : vector<4x290xf32> to vector<4x256xf32>
    %27 = vector.broadcast %14 : vector<1x256xf32> to vector<4x256xf32>
    %28 = arith.mulf %26, %27 : vector<4x256xf32>
    %29 = vector.extract_strided_slice %3 {offsets = [0, 32], sizes = [4, 256], strides = [1, 1]} : vector<4x290xf32> to vector<4x256xf32>
    %30 = vector.broadcast %13 : vector<1x256xf32> to vector<4x256xf32>
    %31 = arith.mulf %29, %30 : vector<4x256xf32>
    %32 = vector.extract_strided_slice %3 {offsets = [0, 33], sizes = [4, 256], strides = [1, 1]} : vector<4x290xf32> to vector<4x256xf32>
    %33 = vector.extract_strided_slice %3 {offsets = [0, 34], sizes = [4, 256], strides = [1, 1]} : vector<4x290xf32> to vector<4x256xf32>
    %34 = vector.broadcast %14 : vector<1x256xf32> to vector<4x256xf32>
    %35 = arith.mulf %33, %34 : vector<4x256xf32>
    %36 = tpu.concatenate %17, %18, %21, %24, %25, %28, %31, %32, %35 in 0 : vector<4x256xf32>, vector<4x256xf32>, vector<4x256xf32>, vector<4x256xf32>, vector<4x256xf32>, vector<4x256xf32>, vector<4x256xf32>, vector<4x256xf32>, vector<4x256xf32> -> vector<36x256xf32>
    %c0_2 = arith.constant 0 : index
    %c0_3 = arith.constant 0 : index
    %37 = vector.load %arg2[%c0_2, %c0_3] : memref<8x36xf32, #tpu.memory_space<vmem>>, vector<8x36xf32>
    %cst_4 = arith.constant dense<0.000000e+00> : vector<8x256xf32>
    %38 = tpu.matmul %37, %36, %cst_4 {dimension_numbers = #tpu.dot_dimension_numbers<[1], [0], [0], [1], [0, 0, 1, 1], [], []>} : vector<8x36xf32>, vector<36x256xf32>, vector<8x256xf32> -> vector<8x256xf32>
    %c0_5 = arith.constant 0 : index
    %c0_6 = arith.constant 0 : index
    %39 = vector.load %arg3[%c0_5, %c0_6] : memref<8x1xf32, #tpu.memory_space<vmem>>, vector<8x1xf32>
    %40 = vector.broadcast %39 : vector<8x1xf32> to vector<8x256xf32>
    %41 = arith.addf %38, %40 : vector<8x256xf32>
    %cst_7 = arith.constant 0.000000e+00 : f32
    %42 = vector.broadcast %cst_7 : f32 to vector<8x256xf32>
    %43 = arith.maximumf %41, %42 : vector<8x256xf32>
    %c0_8 = arith.constant 0 : index
    %c0_9 = arith.constant 0 : index
    %c0_10 = arith.constant 0 : index
    %44 = vector.load %arg4[%c0_8, %c0_9, %c0_10] : memref<1x8x256xf32, #tpu.memory_space<vmem>>, vector<1x8x256xf32>
    %45 = vector.shape_cast %44 : vector<1x8x256xf32> to vector<8x256xf32>
    %46 = vector.shape_cast %43 : vector<8x256xf32> to vector<1x8x256xf32>
    tpu.vector_store %arg4[%c0_8, %c0_9, %c0_10], %46 {strides = array<i32>} : memref<1x8x256xf32, #tpu.memory_space<vmem>>, vector<1x8x256xf32>,
    return
  }
  func.func @transform_0(%arg0: i32) -> (i32, i32, i32) {
    %c0_i32 = arith.constant 0 : i32
    %c0_i32_0 = arith.constant 0 : i32
    %c0_i32_1 = arith.constant 0 : i32
    return %arg0, %c0_i32, %c0_i32_0 : i32, i32, i32
  }
  func.func @transform_1(%arg0: i32) -> (i32, i32) {
    %c0_i32 = arith.constant 0 : i32
    %c0_i32_0 = arith.constant 0 : i32
    %c0_i32_1 = arith.constant 0 : i32
    return %c0_i32, %c0_i32_0 : i32, i32
  }
  func.func @transform_2(%arg0: i32) -> (i32, i32) {
    %c0_i32 = arith.constant 0 : i32
    %c0_i32_0 = arith.constant 0 : i32
    %c0_i32_1 = arith.constant 0 : i32
    return %c0_i32, %c0_i32_0 : i32, i32
  }
  func.func @transform_3(%arg0: i32) -> (i32, i32, i32) {
    %c0_i32 = arith.constant 0 : i32
    %c0_i32_0 = arith.constant 0 : i32
    %c0_i32_1 = arith.constant 0 : i32
    return %arg0, %c0_i32, %c0_i32_0 : i32, i32, i32
  }
}

</mosaic_0001>

<bundles_post_ra>
// kernel: rdb_conv_forward.1
= control target key start
LH: loop header
LB: loop body
LE: loop exit
PB: predicated region body
PF: predicated region fallthrough
CT: control target
= control target key end

     0   :  { %s694_s12 = smov 0   ;;  %s785_s0 = inlined_call_operand.vmem [shape: f32[2,4,256], index: 0, kind: input, shape index: {}]   ;;  %s786_s1 = inlined_call_operand.vmem [shape: f32[8,36], index: 1, kind: input, shape index: {}]   ;;  %s787_s2 = inlined_call_operand.vmem [shape: f32[8,1], index: 2, kind: input, shape index: {}]   ;;  %s788_s3 = inlined_call_operand.vmem [shape: f32[2,8,256], index: 3, kind: output, shape index: {}]  }
   0x1 LB: > { %s529_s13 = sadd.s32 4294967295, %s653_s12   ;;  %p533_p0 = scmp.ge.s32.totalorder %s653_s12, 1  ;;  %s653_s12 = sphi %s694_s12, %s13_s12  }
   0x2   : > { %p137_p1 = scmp.lt.s32.totalorder %s653_s12, 3 }
   0x4   : > { %p138_p2 = pnand %p533_p0, %p137_p1 }
   0x5   : > { %p161_p3 = scmp.lt.s32.totalorder (!%p138_p2), %s529_s13, 1  ;;  %s656_s18 = smov (!%p138_p2), 16  }
   0x6   : > { %141 = sbr.rel (%p138_p2) target bundleno = 554 (0x22a), region = 32  ;;  %s657_s19 = smov (!%p138_p2), 48  }
   0x7   : > { %s658_s20 = smov (!%p138_p2), 80   ;;  %s659_s21 = smov (!%p138_p2), 32  }
   0x8   : > { %s660_s22 = smov (!%p138_p2), 64   ;;  %s661_s23 = smov (!%p138_p2), 96  }
   0x9   : > { %s662_s24 = smov (!%p138_p2), 112   ;;  %s663_s25 = smov (!%p138_p2), 17  }
   0xa   : > { %s664_s26 = smov (!%p138_p2), 34   ;;  %s665_s27 = smov (!%p138_p2), 18  }
   0xb   : > { %v187_v0 = vlaneseq  ;;  %s790_s13 = smov (!%p161_p3, %s529_s13), 1  ;;  %v655_v2 = vmov 0.0   ;;  %vm217_vm2 = vcmask 130048   ;;  %vm219_vm3 = vcmask 261120   ;;  %s666_s28 = smov 2  }
   0xc   : > { %s546_s14 = sshll.u32 %s790_s13, 3  ;;  %vm221_vm4 = vcmask 392192   ;;  %vm223_vm5 = vcmask 523264   ;;  %vm225_vm6 = vcmask 654336   ;;  %vm227_vm7 = vcmask 785408   ;;  %s667_s29 = smov 111  }
   0xd   : > { %v188_v1 = vand.u32 127, %v187_v0  ;;  %s165_s17 = scalar_lea.vmem %s785_s0, %s546_s14  ;;  %vm229_vm8 = vcmask 916480   ;;  %vm180_vm9 = vcmask 138240   ;;  %s668_s30 = smov 95   ;;  %vm403_vm10 = vcmask 769024  }
   0xe   : > { %v171_v6 = vld [vmem:[%s165_s17] sm:$0xff]  ;;  %s669_s4 = smov 94   ;;  %s670_s5 = smov 126   ;;  %vm389_vm11 = vcmask 777216   ;;  %vm406_vm12 = vcmask 1043456   ;;  %vm365_vm13 = vcmask 900096  }
   0xf   : > { %vm189_vm0 = vcmp.ne.s32.totalorder %v188_v1, 0  ;;  %vm192_vm1 = vcmp.ne.s32.totalorder %v188_v1, 15  ;;  %173 = vst [vmem:[#allocation1] ss:$2 sm:$0xff] %v171_v6  ;;  %s671_s6 = smov 110   ;;  %s672_s7 = smov 127  }
  0x10   : > { %v538_v3 = vsel %vm189_vm0, 1.0, %v655_v2  ;;  %v539_v4 = vsel %vm192_vm1, 1.0, %v655_v2  ;;  %vm348_vm14 = vcmask 908288   ;;  %vm307_vm15 = vcmask 1039360   ;;  %s547_s14 = sshll.u32 %s790_s13, 4 }
  0x11   : > { %v575_v5 = vpack.i.bf16 %v538_v3, %v539_v4  ;;  %vm321_vm0 = vcmask 1031168   ;;  %vm422_vm1 = vcmask 293888   ;;  %s170_s17 = scalar_lea.vmem %s788_s3, %s547_s14 }
  0x13   : > { %576 = vrot.lane.b32.xlu0 %v575_v5, %s656_s18  ;;  %586 = vrot.lane.b32.xlu1 %v575_v5, %s657_s19 }
  0x14   : > { %596 = vrot.lane.b32.xlu2 %v575_v5, %s658_s20 }
  0x16   : > { %v174_v7 = vld.sshfl [vmem:[#allocation1] sm:$0xff pattern:$0x75316420]  ;;  %v175_v8 = vld.sshfl [vmem:[#allocation1 + $0x8] sm:$0xff pattern:$0x75316420] }
  0x1b   : > { %581 = vrot.lane.b32.xlu0 %v575_v5, %s659_s21  ;;  %591 = vrot.lane.b32.xlu1 %v575_v5, %s660_s22 }
  0x1c   : > { %601 = vrot.lane.b32.xlu2 %v575_v5, %s661_s23 }
  0x23   : > { %606 = vrot.lane.b32.xlu0 %v575_v5, %s662_s24  ;;  %176 = vrot.lane.b32.xlu1 %v174_v7, %s663_s25 }
  0x24   : > { %178 = vrot.lane.b32.xlu2 %v175_v8, %s663_s25 }
  0x6e   : > { %v597_v11 = vpop.permute.xlu2 %596 }
  0x6f   : > { %v599_v29 = vunpack.i.h.bf16 %v597_v11  ;;  %v598_v30 = vunpack.i.l.bf16 %v597_v11 }
  0x76   : > { %v602_v26 = vpop.permute.xlu2 %601 }
  0x77   : > { %v604_v33 = vunpack.i.h.bf16 %v602_v26  ;;  %v603_v34 = vunpack.i.l.bf16 %v602_v26 }
  0x7e   : > { %v179_v46 = vpop.permute.xlu2 %178 }
  0x7f   : > { %v186_v48 = vsel %vm180_vm9, %v179_v46, 0.0 }
  0x80   : > { %v300_v55 = vrot.slane %v186_v48, 4 }
  0x85   : > { %v577_v9 = vpop.permute.xlu0 %576  ;;  %v587_v10 = vpop.permute.xlu1 %586 }
  0x86   : > { %v579_v12 = vunpack.i.h.bf16 %v577_v9  ;;  %v578_v13 = vunpack.i.l.bf16 %v577_v9  ;;  %v589_v22 = vunpack.i.h.bf16 %v587_v10  ;;  %v588_v23 = vunpack.i.l.bf16 %v587_v10 }
  0x88   : > { %v218_v20 = vsel %vm217_vm2, %v538_v3, %v579_v12  ;;  %v253_v21 = vsel %vm217_vm2, %v539_v4, %v578_v13 }
  0x8d   : > { %v582_v14 = vpop.permute.xlu0 %581  ;;  %v592_v15 = vpop.permute.xlu1 %591 }
  0x8e   : > { %v584_v16 = vunpack.i.h.bf16 %v582_v14  ;;  %v583_v17 = vunpack.i.l.bf16 %v582_v14  ;;  %v594_v18 = vunpack.i.h.bf16 %v592_v15  ;;  %v593_v19 = vunpack.i.l.bf16 %v592_v15 }
  0x90   : > { %v220_v24 = vsel %vm219_vm3, %v218_v20, %v584_v16  ;;  %v254_v25 = vsel %vm219_vm3, %v253_v21, %v583_v17 }
  0x91   : > { %v222_v27 = vsel %vm221_vm4, %v220_v24, %v589_v22  ;;  %v255_v28 = vsel %vm221_vm4, %v254_v25, %v588_v23 }
  0x92   : > { %v224_v31 = vsel %vm223_vm5, %v222_v27, %v594_v18  ;;  %v256_v32 = vsel %vm223_vm5, %v255_v28, %v593_v19 }
  0x93   : > { %v226_v35 = vsel %vm225_vm6, %v224_v31, %v599_v29  ;;  %v257_v36 = vsel %vm225_vm6, %v256_v32, %v598_v30 }
  0x94   : > { %v228_v40 = vsel %vm227_vm7, %v226_v35, %v604_v33  ;;  %v258_v41 = vsel %vm227_vm7, %v257_v36, %v603_v34 }
  0x95   : > { %v607_v37 = vpop.permute.xlu0 %606  ;;  %v177_v47 = vpop.permute.xlu1 %176 }
  0x96   : > { %v609_v38 = vunpack.i.h.bf16 %v607_v37  ;;  %v608_v39 = vunpack.i.l.bf16 %v607_v37  ;;  %v724_v49 = vsel %vm180_vm9, %v177_v47, %v179_v46  ;;  %v726_v50 = vsel %vm180_vm9, 0.0, %v177_v47 }
  0x97   : > { %v298_v51 = vrot.slane %v726_v50, 4  ;;  %v299_v52 = vrot.slane %v724_v49, 4  ;;  %v610_v54 = vpack.i.bf16 %v724_v49, %v726_v50 }
  0x98   : > { %v230_v42 = vsel %vm229_vm8, %v228_v40, %v609_v38  ;;  %v259_v43 = vsel %vm229_vm8, %v258_v41, %v608_v39 }
  0x99   : > { %v718_v44 = vperm.slane %v230_v42, 0  ;;  %v263_v45 = vperm.slane %v259_v43, 0  ;;  %v615_v53 = vpack.i.bf16 %v299_v52, %v298_v51  ;;  %v416_v51 = vld [vmem:[%s787_s2] sm:$0xff]  ;;  %v673_v52 = vmov 0  }
  0x9a   : > { %645 = vset.pattern.permute.xlu1 %v673_v52  ;;  %646 = vset.pattern.permute.xlu0 %v673_v52 }
  0x9b   : > { %290 = vrot.lane.b32.xlu0 %v263_v45, %s664_s26  ;;  %284 = vrot.lane.b32.xlu2 %v718_v44, %s659_s21 }
  0x9c   : > { %278 = vrot.lane.b32.xlu1 %v263_v45, %s665_s27 }
  0xa3   : > { %272 = vrot.lane.b32.xlu0 %v718_v44, %s656_s18  ;;  %387 = vrot.lane.b32.xlu2 %v300_v55, %s668_s30 }
  0xa4   : > { %265 = vrot.lane.b32.xlu1 %v263_v45, %s666_s28 }
  0xab   : > { %611 = vrot.lane.b32.xlu0 %v610_v54, %s667_s29 }
  0xac   : > { %346 = vrot.lane.b32.xlu1 %v186_v48, %s667_s29 }
  0xb4   : > { %616 = vrot.lane.b32.xlu1 %v615_v53, %s668_s30 }
  0xf5   : > { %v285_v61 = vpop.permute.xlu2 %284 }
  0xf6   : > { %v287_v62 = vmul.f32 %v285_v61, %v726_v50  ;;  %v288_v63 = vmul.f32 %v285_v61, %v724_v49  ;;  %v289_v2 = vmul.f32 %v285_v61, %v186_v48 }
  0xf8   : > { %v620_v1 = vpack.i.bf16 %v288_v63, %v287_v62 }
  0xfd   : > { %v388_v22 = vpop.permute.xlu2 %387 }
 0x10d   : > { %v291_v56 = vpop.permute.xlu0 %290 }
 0x10e   : > { %v293_v57 = vmul.f32 %v291_v56, %v726_v50  ;;  %v294_v58 = vmul.f32 %v291_v56, %v724_v49  ;;  %v295_v59 = vmul.f32 %v291_v56, %v186_v48  ;;  %v279_v60 = vpop.permute.xlu1 %278 }
 0x10f   : > { %v283_v7 = vmul.f32 %v279_v60, %v186_v48  ;;  %v281_v9 = vmul.f32 %v279_v60, %v726_v50  ;;  %v282_v10 = vmul.f32 %v279_v60, %v724_v49 }
 0x110   : > { %397 = vrot.lane.b32.xlu2 %v293_v57, %s669_s4  ;;  %401 = vrot.lane.b32.xlu1 %v295_v59, %s669_s4 }
 0x111   : > { %399 = vrot.lane.b32.xlu0 %v294_v58, %s669_s4  ;;  %v358_v14 = vrot.slane %v283_v7, 4  ;;  %v356_v16 = vrot.slane %v281_v9, 4  ;;  %v357_v17 = vrot.slane %v282_v10, 4 }
 0x113   : > { %v630_v20 = vpack.i.bf16 %v357_v17, %v356_v16 }
 0x115   : > { %v273_v6 = vpop.permute.xlu0 %272 }
 0x116   : > { %v266_v0 = vpop.permute.xlu1 %265  ;;  %v277_v8 = vmul.f32 %v273_v6, %v186_v48  ;;  %v275_v12 = vmul.f32 %v273_v6, %v726_v50  ;;  %v276_v13 = vmul.f32 %v273_v6, %v724_v49 }
 0x117   : > { %v268_v3 = vmul.f32 %v266_v0, %v726_v50  ;;  %v269_v4 = vmul.f32 %v266_v0, %v724_v49  ;;  %v270_v11 = vmul.f32 %v266_v0, %v186_v48 }
 0x118   : > { %621 = vrot.lane.b32.xlu2 %v620_v1, %s661_s23  ;;  %v331_v15 = vrot.slane %v277_v8, 4  ;;  %v329_v18 = vrot.slane %v275_v12, 4  ;;  %v330_v19 = vrot.slane %v276_v13, 4 }
 0x119   : > { %377 = vrot.lane.b32.xlu0 %v289_v2, %s661_s23  ;;  %v625_v5 = vpack.i.bf16 %v269_v4, %v268_v3 }
 0x11a   : > { %v635_v21 = vpack.i.bf16 %v330_v19, %v329_v18  ;;  %v262_v18 = vmul.f32 %v718_v44, %v724_v49 }
 0x11b   : > { %626 = vrot.lane.b32.xlu1 %v625_v5, %s670_s5 }
 0x11d   : > { %v612_v28 = vpop.permute.xlu0 %611 }
 0x11e   : > { %v347_v24 = vpop.permute.xlu1 %346  ;;  %v613_v33 = vunpack.i.l.bf16 %v612_v28  ;;  %v614_v34 = vunpack.i.h.bf16 %v612_v28 }
 0x120   : > { %319 = vrot.lane.b32.xlu2 %v270_v11, %s670_s5  ;;  %v349_v45 = vsel %vm348_vm14, %v613_v33, %v614_v34  ;;  %v350_v60 = vsel %vm348_vm14, %v614_v34, %v347_v24 }
 0x121   : > { %363 = vrot.lane.b32.xlu0 %v358_v14, %s671_s6  ;;  %v261_v14 = vmul.f32 %v718_v44, %v726_v50 }
 0x123   : > { %336 = vrot.lane.b32.xlu1 %v331_v15, %s662_s24  ;;  %v415_v15 = vld [vmem:[%s786_s1] sm:$0xff] }
 0x126   : > { %v617_v26 = vpop.permute.xlu1 %616 }
 0x127   : > { %v618_v29 = vunpack.i.l.bf16 %v617_v26  ;;  %v619_v32 = vunpack.i.h.bf16 %v617_v26 }
 0x128   : > { %631 = vrot.lane.b32.xlu2 %v630_v20, %s671_s6 }
 0x129   : > { %636 = vrot.lane.b32.xlu0 %v635_v21, %s662_s24  ;;  %v390_v41 = vsel %vm389_vm11, %v618_v29, %v619_v32  ;;  %v391_v54 = vsel %vm389_vm11, %v619_v32, %v388_v22 }
 0x12b   : > { %419 = vperm.xlu1 %645, %v416_v51  }
 0x130   : > { %641 = vrot.lane.b32.xlu2 %v615_v53, %s672_s7 }
 0x131   : > { %305 = vrot.lane.b32.xlu0 %v300_v55, %s672_s7 }
 0x16a   : > { %v398_v23 = vpop.permute.xlu2 %397 }
 0x172   : > { %v622_v25 = vpop.permute.xlu2 %621 }
 0x173   : > { %v624_v30 = vunpack.i.h.bf16 %v622_v25  ;;  %v623_v31 = vunpack.i.l.bf16 %v622_v25 }
 0x175   : > { %v379_v40 = vsel %vm227_vm7, %v623_v31, %v624_v30 }
 0x176   : > { %v413_v47 = vsel %vm406_vm12, %v379_v40, %v390_v41 }
 0x17a   : > { %v320_v27 = vpop.permute.xlu2 %319 }
 0x182   : > { %v632_v35 = vpop.permute.xlu2 %631  ;;  %v402_v36 = vpop.permute.xlu1 %401 }
 0x183   : > { %v400_v37 = vpop.permute.xlu0 %399  ;;  %v634_v38 = vunpack.i.h.bf16 %v632_v35  ;;  %v633_v39 = vunpack.i.l.bf16 %v632_v35 }
 0x184   : > { %v404_v42 = vsel %vm403_vm10, %v398_v23, %v400_v37  ;;  %v405_v43 = vsel %vm403_vm10, %v400_v37, %v402_v36 }
 0x185   : > { %540 = vmatpush.msk.msra.mxu0 %vm406_vm12, %v404_v42  ;;  %542 = vmatpush.msk.msra.mxu1 %vm406_vm12, %v405_v43  ;;  %v366_v46 = vsel %vm365_vm13, %v633_v39, %v634_v38 }
 0x186   : > { %v411_v48 = vsel %vm406_vm12, %v349_v45, %v366_v46 }
 0x187   : > { %442 = vmatpush.msra.mxu0 %v413_v47 }
 0x189   : > { %443 = vmatpush.msra.mxu0 %v411_v48 }
 0x18a   : > { %v642_v62 = vpop.permute.xlu2 %641 }
 0x18b   : > { %v378_v53 = vpop.permute.xlu0 %377  ;;  %v644_v63 = vunpack.i.h.bf16 %v642_v62  ;;  %v643_v0 = vunpack.i.l.bf16 %v642_v62 }
 0x18c   : > { %v380_v55 = vsel %vm227_vm7, %v624_v30, %v378_v53 }
 0x18d   : > { %v414_v56 = vsel %vm406_vm12, %v380_v55, %v391_v54  ;;  %v627_v57 = vpop.permute.xlu1 %626  ;;  %v308_v7 = vsel %vm307_vm15, %v643_v0, %v644_v63 }
 0x18e   : > { %462 = vmatpush.msra.mxu1 %v414_v56  ;;  %v629_v1 = vunpack.i.h.bf16 %v627_v57  ;;  %v628_v2 = vunpack.i.l.bf16 %v627_v57  ;;  %v407_v16 = vsel %vm406_vm12, %v261_v14, %v308_v7 }
 0x190   : > { %v322_v8 = vsel %vm321_vm0, %v628_v2, %v629_v1  ;;  %v323_v10 = vsel %vm321_vm0, %v629_v1, %v320_v27 }
 0x193   : > { %v364_v58 = vpop.permute.xlu0 %363 }
 0x194   : > { %v367_v59 = vsel %vm365_vm13, %v634_v38, %v364_v58 }
 0x195   : > { %v412_v61 = vsel %vm406_vm12, %v350_v60, %v367_v59  ;;  %v337_v6 = vpop.permute.xlu1 %336 }
 0x196   : > { %463 = vmatpush.msra.mxu1 %v412_v61 }
 0x19b   : > { %v637_v3 = vpop.permute.xlu0 %636 }
 0x19c   : > { %v639_v4 = vunpack.i.h.bf16 %v637_v3  ;;  %v638_v5 = vunpack.i.l.bf16 %v637_v3 }
 0x19d   : > { %v420_v50 = vpop.permute.xlu1 %419 }
 0x19e   : > { %v338_v9 = vsel %vm229_vm8, %v638_v5, %v639_v4  ;;  %v339_v11 = vsel %vm229_vm8, %v639_v4, %v337_v6 }
 0x19f   : > { %v409_v12 = vsel %vm406_vm12, %v322_v8, %v338_v9  ;;  %v410_v13 = vsel %vm406_vm12, %v323_v10, %v339_v11 }
 0x1a0   : > { %444 = vmatpush.msra.mxu0 %v409_v12  ;;  %464 = vmatpush.msra.mxu1 %v410_v13 }
 0x1a2   : > { %445 = vmatpush.msra.mxu0 %v407_v16 }
 0x1a3   : > { %v306_v17 = vpop.permute.xlu0 %305  ;;  %541 = vmatmul.msk.f32.vlgmr.msra.gmra.mxu0 %vm422_vm1, %v415_v15 }
 0x1a4   : > { %v309_v19 = vsel %vm307_vm15, %v644_v63, %v306_v17 }
 0x1a5   : > { %v408_v20 = vsel %vm406_vm12, %v262_v18, %v309_v19 }
 0x1a6   : > { %465 = vmatpush.msra.mxu1 %v408_v20 }
 0x1a7   : > { %543 = vmatmul.msk.f32.vlgmr.msra.gmra.mxu1 %vm422_vm1, %v415_v15 }
 0x220   : > { %v447_v21 = vpop.f32.mrf.mxu0 }
 0x221   : > { %v448_v22 = vadd.f32 %v447_v21, %v420_v50 }
 0x223   : > { %v470_v23 = vmax.f32 %v448_v22, 0.0 }
 0x224   : > { %v467_v24 = vpop.f32.mrf.mxu1 }
 0x225   : > { %472 = vst [vmem:[%s170_s17] sm:$0xff] %v470_v23  ;;  %v468_v25 = vadd.f32 %v467_v24, %v420_v50 }
 0x227   : > { %v471_v44 = vmax.f32 %v468_v25, 0.0 }
 0x229   : > { %473 = vst [vmem:[%s170_s17 + $0x8] sm:$0xff] %v471_v44 }
 0x22a PF: > { %s13_s12 = sadd.s32 1, %s653_s12  }
 0x22b   : > { %p10_p4 = scmp.ge.s32.totalorder %s13_s12, 4  }
 0x22d   :  { %12 = sbr.rel (!%p10_p4) target bundleno = 1 (0x1), region = 62 }

</bundles_post_ra>
